<compile_context>
chip_gen: v6e
topology: v6e:2x2x1
jax: 0.10.0
libtpu: 0.0.40
codegen_flags: <defaults>
</compile_context>

<pallas_src>
import math

import jax
import jax.numpy as jnp
from jax.experimental import pallas as pl
from jax.experimental.pallas import tpu as pltpu

LN_EPS = 1e-5        # PyTorch nn.LayerNorm default eps
RESCALE_EPS = 1e-8   # epsilon used when rescaling rotating-feature magnitudes

# Lazily resolved: does this JAX build accept pl.Buffered(1) (single buffer)
# on constant-index in_specs of a grid pallas_call?  None = unknown.
_SINGLE_BUFFER_CONSTS = None


def _round_up(v, m):
    return (v + m - 1) // m * m


def _vmem_capacity_bytes():
    """Physical VMEM per core; conservative 64 MiB if it cannot be queried."""
    try:
        info = pltpu.get_tpu_info()
        cap = getattr(info, "vmem_capacity_bytes", None)
        if cap:
            return int(cap)
    except Exception:
        pass
    return 64 * 2 ** 20


def _auto_tb(B_p, N, Din_p, Dout_p, mm_bytes, vmem_budget):
    """Batch tile: multiple of 8 dividing B_p, as large as VMEM allows while
    keeping enough grid steps for megacore sharding + intra-core pipelining."""
    # Per-batch-row VMEM (bytes): double-buffered in/out tiles + matmul-dtype
    # operands + f32 working arrays (psi, z, chi/mag/stats), ~1.5x headroom.
    per_row = 4 * (2 * N * Din_p + 2 * N * Dout_p)
    per_row += mm_bytes * (N + 1) * Din_p
    per_row += 4 * (Din_p + (2 * N + 6) * Dout_p)
    per_row = int(1.5 * per_row)
    const_bytes = (2 * 4 + mm_bytes) * Din_p * Dout_p + 8 * (N + 2) * Dout_p
    tb_vmem = max(8, ((vmem_budget - const_bytes) // max(per_row, 1)) // 8 * 8)

    # Keep >= 4 grid steps when the batch allows it (both v7x TensorCores get
    # work and each still has >= 2 steps to pipeline); >= 2 steps otherwise.
    if B_p >= 32:
        min_steps = 4
    elif B_p >= 16:
        min_steps = 2
    else:
        min_steps = 1
    tb_steps = max(8, (B_p // min_steps) // 8 * 8)

    cap = min(B_p, tb_vmem, tb_steps)
    c = max(8, cap // 8 * 8)
    while c > 8 and B_p % c != 0:
        c -= 8
    return c


def rotating_linear(x, w, r_b, gamma, beta, *, tb=None,
                    matmul_dtype=jnp.bfloat16, out_dtype=jnp.float32):
    """x: (B, N, Din); w: (Dout, Din); r_b: (1, N, Dout); gamma/beta: (Dout,).

    matmul_dtype: MXU input dtype for the psi/chi matmuls (bf16 is MXU-native
    on v5e/v6e/v7x; pass jnp.float32 for bit-tight numerics).  Norms,
    LayerNorm and the rescale always run in f32.
    out_dtype: output storage dtype (bf16 halves output HBM traffic, useful
    on v5e when the consumer accepts it).
    """
    global _SINGLE_BUFFER_CONSTS

    B, N, Din = x.shape
    Dout = w.shape[0]
    Din_p = _round_up(Din, 128)
    Dout_p = _round_up(Dout, 128)
    B_p = _round_up(B, 8)                      # keep tiles sublane-dense
    mm_bytes = jnp.dtype(matmul_dtype).itemsize

    vmem_cap = _vmem_capacity_bytes()
    if tb is None:
        tb = _auto_tb(B_p, N, Din_p, Dout_p, mm_bytes, int(0.6 * vmem_cap))
    assert B_p % tb == 0 and tb % 8 == 0, (B_p, tb)

    f32 = jnp.float32
    # Layout plumbing (rotation-leading, lane-dense, zero-padded). Padding is
    # exact-zero through the whole pipeline and sliced off at the end.
    # TODO(synk): adjacent Rotating layers should produce/consume this
    # (N, B, D) layout directly so the pre/post transposes (extra HBM
    # round-trips) disappear at the model level.
    xt = jnp.transpose(jnp.asarray(x, f32), (1, 0, 2))                   # (N, B, Din)
    xt = jnp.pad(xt, ((0, 0), (0, B_p - B), (0, Din_p - Din)))           # (N, B_p, Din_p)
    wt = jnp.pad(jnp.asarray(w, f32).T,
                 ((0, Din_p - Din), (0, Dout_p - Dout)))                 # (Din_p, Dout_p)
    rb = jnp.pad(jnp.asarray(r_b, f32).reshape(N, Dout),
                 ((0, 0), (0, Dout_p - Dout)))                           # (N, Dout_p)
    g = jnp.pad(jnp.asarray(gamma, f32).reshape(1, Dout),
                ((0, 0), (0, Dout_p - Dout)))                            # (1, Dout_p)
    bta = jnp.pad(jnp.asarray(beta, f32).reshape(1, Dout),
                  ((0, 0), (0, Dout_p - Dout)))                          # (1, Dout_p)

    inv_dout = 1.0 / float(Dout)   # LayerNorm statistics over the REAL Dout

    def kernel(x_ref, wt_ref, rb_ref, g_ref, b_ref, o_ref):
        # x_ref : (N, tb, Din_p)   rotation-leading batch tile of x (f32)
        # wt_ref: (Din_p, Dout_p)  W^T, zero-padded, constant-index (resident)
        # rb_ref: (N, Dout_p)      rotation bias
        # g_ref : (1, Dout_p)      LayerNorm gamma (pad cols = 0)
        # b_ref : (1, Dout_p)      LayerNorm beta  (pad cols = 0)
        # o_ref : (N, tb, Dout_p)
        n, tbk, d_in = x_ref.shape
        d_out = wt_ref.shape[1]

        x_f32 = x_ref[...]
        w_mm = wt_ref[...].astype(matmul_dtype)

        # |x| over the rotation axis: reduction over the LEADING dim -> pure
        # VALU adds + one sqrt per element, no cross-lane work.
        x_mag = jnp.sqrt(jnp.sum(x_f32 * x_f32, axis=0))                 # (tb, Din_p)

        # Two MXU matmuls against the same resident W^T (no concatenate copy;
        # collapsing the leading dims of a (N, tb, Din_p) tile with tb % 8 == 0
        # and Din_p % 128 == 0 is tile-aligned, i.e. a free view).
        psi = jnp.dot(x_f32.reshape(n * tbk, d_in).astype(matmul_dtype), w_mm,
                      preferred_element_type=jnp.float32).reshape(n, tbk, d_out)
        chi = jnp.dot(x_mag.astype(matmul_dtype), w_mm,
                      preferred_element_type=jnp.float32)                # (tb, Dout_p)

        # z = psi + rotation bias (broadcast over the batch tile).
        z = psi + rb_ref[...][:, None, :]

        # Magnitude over the rotation axis.
        mag_psi = jnp.sqrt(jnp.sum(psi * psi, axis=0))                   # (tb, Dout_p)
        mag = 0.5 * (mag_psi + chi)

        # LayerNorm over the REAL out_features + ReLU. Pad columns of `mag`
        # are exactly 0 (W / rb / gamma / beta pads are 0), so padded-lane sums
        # equal real-Dout sums; the E[x^2] - mu^2 form keeps that true for the
        # variance too (a centered form would pick up -mu at pad lanes).
        mu = jnp.sum(mag, axis=-1, keepdims=True) * inv_dout
        var = jnp.maximum(
            jnp.sum(mag * mag, axis=-1, keepdims=True) * inv_dout - mu * mu, 0.0)
        ln = (mag - mu) * jax.lax.rsqrt(var + LN_EPS) * g_ref[...] + b_ref[...]
        mag = jnp.maximum(ln, 0.0)

        # Rescale z so its per-(b, out) magnitude over the rotation axis == mag.
        # One EUP rsqrt; max(sumsq, eps^2) floors the denominator like the
        # reference's "+ eps" (differs only when ||z|| ~ eps = 1e-8).
        sumsq = jnp.sum(z * z, axis=0)                                   # (tb, Dout_p)
        inv_norm = jax.lax.rsqrt(jnp.maximum(sumsq, RESCALE_EPS * RESCALE_EPS))
        o_ref[...] = (z * (inv_norm * mag)[None, :, :]).astype(o_ref.dtype)

    grid = (B_p // tb,)

    # Per-step VMEM estimate (pipelined x/out tiles, constants, working
    # arrays), with headroom; cap generation-aware at 75% of physical VMEM
    # (v7x: ~48 MiB, v5e/v6e: ~96 MiB).
    est = (4 * (2 * N * tb * Din_p + 2 * N * tb * Dout_p)
           + mm_bytes * (tb * (N + 1) * Din_p + Din_p * Dout_p)
           + 4 * tb * (Din_p + (2 * N + 6) * Dout_p)
           + 2 * 4 * (Din_p * Dout_p + (N + 2) * Dout_p))
    vmem_limit = int(min(max(2 * est, 32 * 2 ** 20), int(0.75 * vmem_cap)))

    cost = pl.CostEstimate(
        flops=2 * B_p * (N + 1) * Din_p * Dout_p + 12 * B_p * N * Dout_p,
        transcendentals=B_p * (Din_p + 3 * Dout_p),
        bytes_accessed=(4 * B_p * N * Din_p
                        + B_p * N * Dout_p * jnp.dtype(out_dtype).itemsize
                        + 4 * (Din_p * Dout_p + (N + 2) * Dout_p)),
    )

    def build(const_mode):
        def const_spec(shape):
            if const_mode is None:
                return pl.BlockSpec(shape, lambda i: (0, 0))
            return pl.BlockSpec(shape, lambda i: (0, 0), pipeline_mode=const_mode)

        return pl.pallas_call(
            kernel,
            out_shape=jax.ShapeDtypeStruct((N, B_p, Dout_p), out_dtype),
            grid_spec=pltpu.PrefetchScalarGridSpec(
                num_scalar_prefetch=0,
                grid=grid,
                in_specs=[
                    pl.BlockSpec((N, tb, Din_p), lambda i: (0, i, 0)),   # x tile
                    const_spec((Din_p, Dout_p)),                         # W^T
                    const_spec((N, Dout_p)),                             # rotation bias
                    const_spec((1, Dout_p)),                             # LN gamma
                    const_spec((1, Dout_p)),                             # LN beta
                ],
                out_specs=pl.BlockSpec((N, tb, Dout_p), lambda i: (0, i, 0)),
            ),
            compiler_params=pltpu.CompilerParams(
                dimension_semantics=("parallel",),
                vmem_limit_bytes=vmem_limit,
            ),
            cost_estimate=cost,
        )

    out = None
    if _SINGLE_BUFFER_CONSTS is not False:
        try:
            # Constant-index operands single-buffered: halves their VMEM cost
            # (the W^T double buffer is the dominant constant cost on v7x).
            out = build(pl.Buffered(1))(xt, wt, rb, g, bta)
            _SINGLE_BUFFER_CONSTS = True
        except Exception:
            _SINGLE_BUFFER_CONSTS = False
    if out is None:
        # Fallback: default pipeline (constants still DMA'd only once, they
        # just keep an extra buffer each).
        out = build(None)(xt, wt, rb, g, bta)

    # Layout plumbing back to (B, N, Dout); drop batch and lane padding.
    return jnp.transpose(out, (1, 0, 2))[:B, :, :Dout]


def rotating_linear_reference(x, w, r_b, gamma, beta):
    """Pure-JAX f32 reference of the same forward pass."""
    psi = jnp.einsum("bni,oi->bno", x, w)
    z = psi + r_b
    mag_psi = jnp.linalg.norm(psi, axis=1)
    chi = jnp.einsum("bi,oi->bo", jnp.linalg.norm(x, axis=1), w)
    mag = 0.5 * (mag_psi + chi)
    mu = mag.mean(-1, keepdims=True)
    var = ((mag - mu) ** 2).mean(-1, keepdims=True)
    mag = jnp.maximum((mag - mu) / jnp.sqrt(var + LN_EPS) * gamma + beta, 0.0)
    z_norm = jnp.linalg.norm(z, axis=1, keepdims=True)
    return z / (z_norm + RESCALE_EPS) * mag[:, None, :]


if __name__ == "__main__":
    # Small shapes consistent with the module: batch=16, rotation_dims=2,
    # in_features=32, out_features=32.
    B, N, Din, Dout = 16, 2, 32, 32

    key = jax.random.PRNGKey(0)
    kx, kw, kb = jax.random.split(key, 3)

    x = jax.random.normal(kx, (B, N, Din), dtype=jnp.float32)

    # nn.Linear(in, out, bias=False) style uniform(+-1/sqrt(fan_in)) weight.
    w_bound = math.sqrt(1.0 / Din)
    w = jax.random.uniform(kw, (Dout, Din), jnp.float32, -w_bound, w_bound)

    # rotation bias: uniform(-1/sqrt(fan_in), 1/sqrt(fan_in)), shape (1, N, Dout).
    rb_bound = 1.0 / math.sqrt(Din)
    r_b = jax.random.uniform(kb, (1, N, Dout), jnp.float32, -rb_bound, rb_bound)

    # LayerNorm(elementwise_affine=True) init: gamma=1, beta=0.
    gamma = jnp.ones((Dout,), jnp.float32)
    beta = jnp.zeros((Dout,), jnp.float32)

    ref = rotating_linear_reference(x, w, r_b, gamma, beta)

    # f32 MXU path: bit-tight numerics check.
    out_f32 = jax.block_until_ready(
        rotating_linear(x, w, r_b, gamma, beta, matmul_dtype=jnp.float32))
    assert out_f32.shape == (B, N, Dout)
    err_f32 = float(jnp.max(jnp.abs(out_f32 - ref)))
    assert err_f32 < 1e-3, err_f32

    # Default bf16-MXU path (norms / LayerNorm / rescale stay f32): looser
    # tolerance purely from bf16 matmul inputs.
    out = jax.block_until_ready(rotating_linear(x, w, r_b, gamma, beta))
    assert out.shape == (B, N, Dout)
    err_bf16 = float(jnp.max(jnp.abs(out - ref)))
    assert err_bf16 < 1e-1, err_bf16

    print("KERNEL_OK")
</pallas_src>

<mosaic_0001>
module attributes {stable_mosaic.version = 11 : i64} {
  func.func @kernel(%arg0: i32, %arg1: memref<2x8x128xf32, #tpu.memory_space<vmem>>, %arg2: memref<128x128xf32, #tpu.memory_space<vmem>>, %arg3: memref<2x128xf32, #tpu.memory_space<vmem>>, %arg4: memref<1x128xf32, #tpu.memory_space<vmem>>, %arg5: memref<1x128xf32, #tpu.memory_space<vmem>>, %arg6: memref<2x8x128xf32, #tpu.memory_space<vmem>>) attributes {dimension_semantics = [#tpu.dimension_semantics<parallel>], iteration_bounds = array<i64: 2>, scalar_prefetch = 0 : i64, scratch_operands = 0 : i64, tpu.core_type = #tpu.core_type<tc>, window_params = [{transform_indices = @transform_0, window_bounds = array<i64: 2, 8, 128>}, {pipeline_mode = #tpu.pipeline_mode<synchronous>, transform_indices = @transform_1, window_bounds = array<i64: 128, 128>}, {pipeline_mode = #tpu.pipeline_mode<synchronous>, transform_indices = @transform_2, window_bounds = array<i64: 2, 128>}, {pipeline_mode = #tpu.pipeline_mode<synchronous>, transform_indices = @transform_3, window_bounds = array<i64: 1, 128>}, {pipeline_mode = #tpu.pipeline_mode<synchronous>, transform_indices = @transform_4, window_bounds = array<i64: 1, 128>}, {transform_indices = @transform_5, window_bounds = array<i64: 2, 8, 128>}]} {
    %c0 = arith.constant 0 : index
    %c0_0 = arith.constant 0 : index
    %c0_1 = arith.constant 0 : index
    %0 = vector.load %arg1[%c0, %c0_0, %c0_1] : memref<2x8x128xf32, #tpu.memory_space<vmem>>, vector<2x8x128xf32>
    %c0_2 = arith.constant 0 : index
    %c0_3 = arith.constant 0 : index
    %1 = vector.load %arg2[%c0_2, %c0_3] : memref<128x128xf32, #tpu.memory_space<vmem>>, vector<128x128xf32>
    %2 = arith.mulf %0, %0 : vector<2x8x128xf32>
    %cst = arith.constant dense<0.000000e+00> : vector<8x128xf32>
    %3 = vector.multi_reduction <add>, %2, %cst [0] : vector<2x8x128xf32> to vector<8x128xf32>
    %4 = math.sqrt %3 : vector<8x128xf32>
    %5 = vector.shape_cast %0 : vector<2x8x128xf32> to vector<16x128xf32>
    %cst_4 = arith.constant dense<0.000000e+00> : vector<16x128xf32>
    %6 = tpu.matmul %5, %1, %cst_4 {dimension_numbers = #tpu.dot_dimension_numbers<[1], [0], [0], [1], [0, 0, 1, 1], [], []>} : vector<16x128xf32>, vector<128x128xf32>, vector<16x128xf32> -> vector<16x128xf32>
    %7 = vector.shape_cast %6 : vector<16x128xf32> to vector<2x8x128xf32>
    %cst_5 = arith.constant dense<0.000000e+00> : vector<8x128xf32>
    %8 = tpu.matmul %4, %1, %cst_5 {dimension_numbers = #tpu.dot_dimension_numbers<[1], [0], [0], [1], [0, 0, 1, 1], [], []>} : vector<8x128xf32>, vector<128x128xf32>, vector<8x128xf32> -> vector<8x128xf32>
    %c0_6 = arith.constant 0 : index
    %c0_7 = arith.constant 0 : index
    %9 = vector.load %arg3[%c0_6, %c0_7] : memref<2x128xf32, #tpu.memory_space<vmem>>, vector<2x128xf32>
    %10 = vector.shape_cast %9 : vector<2x128xf32> to vector<2x1x128xf32>
    %11 = vector.broadcast %10 : vector<2x1x128xf32> to vector<2x8x128xf32>
    %12 = arith.addf %7, %11 : vector<2x8x128xf32>
    %13 = arith.mulf %7, %7 : vector<2x8x128xf32>
    %cst_8 = arith.constant dense<0.000000e+00> : vector<8x128xf32>
    %14 = vector.multi_reduction <add>, %13, %cst_8 [0] : vector<2x8x128xf32> to vector<8x128xf32>
    %15 = math.sqrt %14 : vector<8x128xf32>
    %16 = arith.addf %15, %8 : vector<8x128xf32>
    %cst_9 = arith.constant 5.000000e-01 : f32
    %17 = vector.broadcast %cst_9 : f32 to vector<8x128xf32>
    %18 = arith.mulf %17, %16 : vector<8x128xf32>
    %cst_10 = arith.constant dense<0.000000e+00> : vector<8xf32>
    %19 = vector.multi_reduction <add>, %18, %cst_10 [1] : vector<8x128xf32> to vector<8xf32>
    %20 = vector.shape_cast %19 : vector<8xf32> to vector<8x1xf32>
    %cst_11 = arith.constant 3.125000e-02 : f32
    %21 = vector.broadcast %cst_11 : f32 to vector<8x1xf32>
    %22 = arith.mulf %20, %21 : vector<8x1xf32>
    %23 = arith.mulf %18, %18 : vector<8x128xf32>
    %cst_12 = arith.constant dense<0.000000e+00> : vector<8xf32>
    %24 = vector.multi_reduction <add>, %23, %cst_12 [1] : vector<8x128xf32> to vector<8xf32>
    %25 = vector.shape_cast %24 : vector<8xf32> to vector<8x1xf32>
    %cst_13 = arith.constant 3.125000e-02 : f32
    %26 = vector.broadcast %cst_13 : f32 to vector<8x1xf32>
    %27 = arith.mulf %25, %26 : vector<8x1xf32>
    %28 = arith.mulf %22, %22 : vector<8x1xf32>
    %29 = arith.subf %27, %28 : vector<8x1xf32>
    %cst_14 = arith.constant 0.000000e+00 : f32
    %30 = vector.broadcast %cst_14 : f32 to vector<8x1xf32>
    %31 = arith.maximumf %29, %30 : vector<8x1xf32>
    %32 = vector.broadcast %22 : vector<8x1xf32> to vector<8x128xf32>
    %33 = arith.subf %18, %32 : vector<8x128xf32>
    %cst_15 = arith.constant 9.99999974E-6 : f32
    %34 = vector.broadcast %cst_15 : f32 to vector<8x1xf32>
    %35 = arith.addf %31, %34 : vector<8x1xf32>
    %36 = math.rsqrt %35 : vector<8x1xf32>
    %37 = vector.broadcast %36 : vector<8x1xf32> to vector<8x128xf32>
    %38 = arith.mulf %33, %37 : vector<8x128xf32>
    %c0_16 = arith.constant 0 : index
    %c0_17 = arith.constant 0 : index
    %39 = vector.load %arg4[%c0_16, %c0_17] : memref<1x128xf32, #tpu.memory_space<vmem>>, vector<1x128xf32>
    %40 = vector.broadcast %39 : vector<1x128xf32> to vector<8x128xf32>
    %41 = arith.mulf %38, %40 : vector<8x128xf32>
    %c0_18 = arith.constant 0 : index
    %c0_19 = arith.constant 0 : index
    %42 = vector.load %arg5[%c0_18, %c0_19] : memref<1x128xf32, #tpu.memory_space<vmem>>, vector<1x128xf32>
    %43 = vector.broadcast %42 : vector<1x128xf32> to vector<8x128xf32>
    %44 = arith.addf %41, %43 : vector<8x128xf32>
    %cst_20 = arith.constant 0.000000e+00 : f32
    %45 = vector.broadcast %cst_20 : f32 to vector<8x128xf32>
    %46 = arith.maximumf %44, %45 : vector<8x128xf32>
    %47 = arith.mulf %12, %12 : vector<2x8x128xf32>
    %cst_21 = arith.constant dense<0.000000e+00> : vector<8x128xf32>
    %48 = vector.multi_reduction <add>, %47, %cst_21 [0] : vector<2x8x128xf32> to vector<8x128xf32>
    %cst_22 = arith.constant 1.000000e-16 : f32
    %49 = vector.broadcast %cst_22 : f32 to vector<8x128xf32>
    %50 = arith.maximumf %48, %49 : vector<8x128xf32>
    %51 = math.rsqrt %50 : vector<8x128xf32>
    %52 = arith.mulf %51, %46 : vector<8x128xf32>
    %53 = vector.shape_cast %52 : vector<8x128xf32> to vector<1x8x128xf32>
    %54 = vector.broadcast %53 : vector<1x8x128xf32> to vector<2x8x128xf32>
    %55 = arith.mulf %12, %54 : vector<2x8x128xf32>
    %c0_23 = arith.constant 0 : index
    %c0_24 = arith.constant 0 : index
    %c0_25 = arith.constant 0 : index
    %56 = vector.load %arg6[%c0_23, %c0_24, %c0_25] : memref<2x8x128xf32, #tpu.memory_space<vmem>>, vector<2x8x128xf32>
    tpu.vector_store %arg6[%c0_23, %c0_24, %c0_25], %55 {strides = array<i32>} : memref<2x8x128xf32, #tpu.memory_space<vmem>>, vector<2x8x128xf32>,
    return
  }
  func.func @transform_0(%arg0: i32) -> (i32, i32, i32) {
    %c0_i32 = arith.constant 0 : i32
    %c0_i32_0 = arith.constant 0 : i32
    %c0_i32_1 = arith.constant 0 : i32
    return %c0_i32, %arg0, %c0_i32_0 : i32, i32, i32
  }
  func.func @transform_1(%arg0: i32) -> (i32, i32) {
    %c0_i32 = arith.constant 0 : i32
    %c0_i32_0 = arith.constant 0 : i32
    %c0_i32_1 = arith.constant 0 : i32
    return %c0_i32, %c0_i32_0 : i32, i32
  }
  func.func @transform_2(%arg0: i32) -> (i32, i32) {
    %c0_i32 = arith.constant 0 : i32
    %c0_i32_0 = arith.constant 0 : i32
    %c0_i32_1 = arith.constant 0 : i32
    return %c0_i32, %c0_i32_0 : i32, i32
  }
  func.func @transform_3(%arg0: i32) -> (i32, i32) {
    %c0_i32 = arith.constant 0 : i32
    %c0_i32_0 = arith.constant 0 : i32
    %c0_i32_1 = arith.constant 0 : i32
    return %c0_i32, %c0_i32_0 : i32, i32
  }
  func.func @transform_4(%arg0: i32) -> (i32, i32) {
    %c0_i32 = arith.constant 0 : i32
    %c0_i32_0 = arith.constant 0 : i32
    %c0_i32_1 = arith.constant 0 : i32
    return %c0_i32, %c0_i32_0 : i32, i32
  }
  func.func @transform_5(%arg0: i32) -> (i32, i32, i32) {
    %c0_i32 = arith.constant 0 : i32
    %c0_i32_0 = arith.constant 0 : i32
    %c0_i32_1 = arith.constant 0 : i32
    return %c0_i32, %arg0, %c0_i32_0 : i32, i32, i32
  }
}

module attributes {stable_mosaic.version = 11 : i64} {
  func.func @kernel(%arg0: i32, %arg1: memref<2x8x128xf32, #tpu.memory_space<vmem>>, %arg2: memref<128x128xf32, #tpu.memory_space<vmem>>, %arg3: memref<2x128xf32, #tpu.memory_space<vmem>>, %arg4: memref<1x128xf32, #tpu.memory_space<vmem>>, %arg5: memref<1x128xf32, #tpu.memory_space<vmem>>, %arg6: memref<2x8x128xf32, #tpu.memory_space<vmem>>) attributes {dimension_semantics = [#tpu.dimension_semantics<parallel>], iteration_bounds = array<i64: 2>, scalar_prefetch = 0 : i64, scratch_operands = 0 : i64, tpu.core_type = #tpu.core_type<tc>, window_params = [{transform_indices = @transform_0, window_bounds = array<i64: 2, 8, 128>}, {pipeline_mode = #tpu.pipeline_mode<synchronous>, transform_indices = @transform_1, window_bounds = array<i64: 128, 128>}, {pipeline_mode = #tpu.pipeline_mode<synchronous>, transform_indices = @transform_2, window_bounds = array<i64: 2, 128>}, {pipeline_mode = #tpu.pipeline_mode<synchronous>, transform_indices = @transform_3, window_bounds = array<i64: 1, 128>}, {pipeline_mode = #tpu.pipeline_mode<synchronous>, transform_indices = @transform_4, window_bounds = array<i64: 1, 128>}, {transform_indices = @transform_5, window_bounds = array<i64: 2, 8, 128>}]} {
    %c0 = arith.constant 0 : index
    %c0_0 = arith.constant 0 : index
    %c0_1 = arith.constant 0 : index
    %0 = vector.load %arg1[%c0, %c0_0, %c0_1] : memref<2x8x128xf32, #tpu.memory_space<vmem>>, vector<2x8x128xf32>
    %c0_2 = arith.constant 0 : index
    %c0_3 = arith.constant 0 : index
    %1 = vector.load %arg2[%c0_2, %c0_3] : memref<128x128xf32, #tpu.memory_space<vmem>>, vector<128x128xf32>
    %2 = arith.mulf %0, %0 : vector<2x8x128xf32>
    %cst = arith.constant dense<0.000000e+00> : vector<8x128xf32>
    %3 = vector.multi_reduction <add>, %2, %cst [0] : vector<2x8x128xf32> to vector<8x128xf32>
    %4 = math.sqrt %3 : vector<8x128xf32>
    %5 = vector.shape_cast %0 : vector<2x8x128xf32> to vector<16x128xf32>
    %cst_4 = arith.constant dense<0.000000e+00> : vector<16x128xf32>
    %6 = tpu.matmul %5, %1, %cst_4 {dimension_numbers = #tpu.dot_dimension_numbers<[1], [0], [0], [1], [0, 0, 1, 1], [], []>} : vector<16x128xf32>, vector<128x128xf32>, vector<16x128xf32> -> vector<16x128xf32>
    %7 = vector.shape_cast %6 : vector<16x128xf32> to vector<2x8x128xf32>
    %cst_5 = arith.constant dense<0.000000e+00> : vector<8x128xf32>
    %8 = tpu.matmul %4, %1, %cst_5 {dimension_numbers = #tpu.dot_dimension_numbers<[1], [0], [0], [1], [0, 0, 1, 1], [], []>} : vector<8x128xf32>, vector<128x128xf32>, vector<8x128xf32> -> vector<8x128xf32>
    %c0_6 = arith.constant 0 : index
    %c0_7 = arith.constant 0 : index
    %9 = vector.load %arg3[%c0_6, %c0_7] : memref<2x128xf32, #tpu.memory_space<vmem>>, vector<2x128xf32>
    %10 = vector.shape_cast %9 : vector<2x128xf32> to vector<2x1x128xf32>
    %11 = vector.broadcast %10 : vector<2x1x128xf32> to vector<2x8x128xf32>
    %12 = arith.addf %7, %11 : vector<2x8x128xf32>
    %13 = arith.mulf %7, %7 : vector<2x8x128xf32>
    %cst_8 = arith.constant dense<0.000000e+00> : vector<8x128xf32>
    %14 = vector.multi_reduction <add>, %13, %cst_8 [0] : vector<2x8x128xf32> to vector<8x128xf32>
    %15 = math.sqrt %14 : vector<8x128xf32>
    %16 = arith.addf %15, %8 : vector<8x128xf32>
    %cst_9 = arith.constant 5.000000e-01 : f32
    %17 = vector.broadcast %cst_9 : f32 to vector<8x128xf32>
    %18 = arith.mulf %17, %16 : vector<8x128xf32>
    %cst_10 = arith.constant dense<0.000000e+00> : vector<8xf32>
    %19 = vector.multi_reduction <add>, %18, %cst_10 [1] : vector<8x128xf32> to vector<8xf32>
    %20 = vector.shape_cast %19 : vector<8xf32> to vector<8x1xf32>
    %cst_11 = arith.constant 3.125000e-02 : f32
    %21 = vector.broadcast %cst_11 : f32 to vector<8x1xf32>
    %22 = arith.mulf %20, %21 : vector<8x1xf32>
    %23 = arith.mulf %18, %18 : vector<8x128xf32>
    %cst_12 = arith.constant dense<0.000000e+00> : vector<8xf32>
    %24 = vector.multi_reduction <add>, %23, %cst_12 [1] : vector<8x128xf32> to vector<8xf32>
    %25 = vector.shape_cast %24 : vector<8xf32> to vector<8x1xf32>
    %cst_13 = arith.constant 3.125000e-02 : f32
    %26 = vector.broadcast %cst_13 : f32 to vector<8x1xf32>
    %27 = arith.mulf %25, %26 : vector<8x1xf32>
    %28 = arith.mulf %22, %22 : vector<8x1xf32>
    %29 = arith.subf %27, %28 : vector<8x1xf32>
    %cst_14 = arith.constant 0.000000e+00 : f32
    %30 = vector.broadcast %cst_14 : f32 to vector<8x1xf32>
    %31 = arith.maximumf %29, %30 : vector<8x1xf32>
    %32 = vector.broadcast %22 : vector<8x1xf32> to vector<8x128xf32>
    %33 = arith.subf %18, %32 : vector<8x128xf32>
    %cst_15 = arith.constant 9.99999974E-6 : f32
    %34 = vector.broadcast %cst_15 : f32 to vector<8x1xf32>
    %35 = arith.addf %31, %34 : vector<8x1xf32>
    %36 = math.rsqrt %35 : vector<8x1xf32>
    %37 = vector.broadcast %36 : vector<8x1xf32> to vector<8x128xf32>
    %38 = arith.mulf %33, %37 : vector<8x128xf32>
    %c0_16 = arith.constant 0 : index
    %c0_17 = arith.constant 0 : index
    %39 = vector.load %arg4[%c0_16, %c0_17] : memref<1x128xf32, #tpu.memory_space<vmem>>, vector<1x128xf32>
    %40 = vector.broadcast %39 : vector<1x128xf32> to vector<8x128xf32>
    %41 = arith.mulf %38, %40 : vector<8x128xf32>
    %c0_18 = arith.constant 0 : index
    %c0_19 = arith.constant 0 : index
    %42 = vector.load %arg5[%c0_18, %c0_19] : memref<1x128xf32, #tpu.memory_space<vmem>>, vector<1x128xf32>
    %43 = vector.broadcast %42 : vector<1x128xf32> to vector<8x128xf32>
    %44 = arith.addf %41, %43 : vector<8x128xf32>
    %cst_20 = arith.constant 0.000000e+00 : f32
    %45 = vector.broadcast %cst_20 : f32 to vector<8x128xf32>
    %46 = arith.maximumf %44, %45 : vector<8x128xf32>
    %47 = arith.mulf %12, %12 : vector<2x8x128xf32>
    %cst_21 = arith.constant dense<0.000000e+00> : vector<8x128xf32>
    %48 = vector.multi_reduction <add>, %47, %cst_21 [0] : vector<2x8x128xf32> to vector<8x128xf32>
    %cst_22 = arith.constant 1.000000e-16 : f32
    %49 = vector.broadcast %cst_22 : f32 to vector<8x128xf32>
    %50 = arith.maximumf %48, %49 : vector<8x128xf32>
    %51 = math.rsqrt %50 : vector<8x128xf32>
    %52 = arith.mulf %51, %46 : vector<8x128xf32>
    %53 = vector.shape_cast %52 : vector<8x128xf32> to vector<1x8x128xf32>
    %54 = vector.broadcast %53 : vector<1x8x128xf32> to vector<2x8x128xf32>
    %55 = arith.mulf %12, %54 : vector<2x8x128xf32>
    %c0_23 = arith.constant 0 : index
    %c0_24 = arith.constant 0 : index
    %c0_25 = arith.constant 0 : index
    %56 = vector.load %arg6[%c0_23, %c0_24, %c0_25] : memref<2x8x128xf32, #tpu.memory_space<vmem>>, vector<2x8x128xf32>
    tpu.vector_store %arg6[%c0_23, %c0_24, %c0_25], %55 {strides = array<i32>} : memref<2x8x128xf32, #tpu.memory_space<vmem>>, vector<2x8x128xf32>,
    return
  }
  func.func @transform_0(%arg0: i32) -> (i32, i32, i32) {
    %c0_i32 = arith.constant 0 : i32
    %c0_i32_0 = arith.constant 0 : i32
    %c0_i32_1 = arith.constant 0 : i32
    return %c0_i32, %arg0, %c0_i32_0 : i32, i32, i32
  }
  func.func @transform_1(%arg0: i32) -> (i32, i32) {
    %c0_i32 = arith.constant 0 : i32
    %c0_i32_0 = arith.constant 0 : i32
    %c0_i32_1 = arith.constant 0 : i32
    return %c0_i32, %c0_i32_0 : i32, i32
  }
  func.func @transform_2(%arg0: i32) -> (i32, i32) {
    %c0_i32 = arith.constant 0 : i32
    %c0_i32_0 = arith.constant 0 : i32
    %c0_i32_1 = arith.constant 0 : i32
    return %c0_i32, %c0_i32_0 : i32, i32
  }
  func.func @transform_3(%arg0: i32) -> (i32, i32) {
    %c0_i32 = arith.constant 0 : i32
    %c0_i32_0 = arith.constant 0 : i32
    %c0_i32_1 = arith.constant 0 : i32
    return %c0_i32, %c0_i32_0 : i32, i32
  }
  func.func @transform_4(%arg0: i32) -> (i32, i32) {
    %c0_i32 = arith.constant 0 : i32
    %c0_i32_0 = arith.constant 0 : i32
    %c0_i32_1 = arith.constant 0 : i32
    return %c0_i32, %c0_i32_0 : i32, i32
  }
  func.func @transform_5(%arg0: i32) -> (i32, i32, i32) {
    %c0_i32 = arith.constant 0 : i32
    %c0_i32_0 = arith.constant 0 : i32
    %c0_i32_1 = arith.constant 0 : i32
    return %c0_i32, %arg0, %c0_i32_0 : i32, i32, i32
  }
}

</mosaic_0001>

<bundles_post_ra>
// kernel: tpu_custom_call.1
= control target key start
LH: loop header
LB: loop body
LE: loop exit
PB: predicated region body
PF: predicated region fallthrough
CT: control target
= control target key end

     0   :  { %10 = vsyncpa [#allocation3], 0  ;;  %s1208_s0 = inlined_call_operand.hbm [shape: f32[2,16,128], index: 0, kind: input, shape index: {}]   ;;  %s1209_s1 = inlined_call_operand.hbm [shape: f32[128,128], index: 1, kind: input, shape index: {}]   ;;  %s1210_s2 = inlined_call_operand.vmem [shape: f32[2,128], index: 2, kind: input, shape index: {}]   ;;  %s1211_s3 = inlined_call_operand.vmem [shape: f32[1,128], index: 3, kind: input, shape index: {}]   ;;  %s1212_s4 = inlined_call_operand.vmem [shape: f32[1,128], index: 4, kind: input, shape index: {}]   ;;  %s1213_s5 = inlined_call_operand.hbm [shape: f32[2,16,128], index: 5, kind: output, shape index: {}]  }
   0x1   :  { %12 = vsyncpa [#allocation3 + $0x1], 0 }
   0x2   :  { %13 = vsyncpa [#allocation6], 0 }
   0x3   :  { %14 = vsyncpa [#allocation4], 0 }
   0x4   :  { %16 = vsyncpa [#allocation4 + $0x1], 0  ;;  %s977_s18 = smov 0   ;;  %s979_s19 = smov 0  }
   0x5   :  { %s981_s20 = smov 0   ;;  %s983_s21 = smov 0  }
   0x6 LB: > { %s998_s22 = sadd.s32 4294967295, %s933_s21   ;;  %s615_s23 = sadd.s32 4294967294, %s933_s21   ;;  %s933_s21 = sphi %s983_s21, %s1237_s21   ;;  %s929_s20 = sphi %s981_s20, %s1236_s20   ;;  %s925_s19 = sphi %s979_s19, %s1235_s19   ;;  %s921_s18 = sphi %s977_s18, %s1234_s18  }
   0x7   : > { %s1002_s24 = sadd.s32 1, %s933_s21   ;;  %s29_s25 = sadd.s32 1, %s929_s20 }
   0x8   : > { %s26_s26 = ssub.s32 %s933_s21, %s1002_s24  ;;  %p36_p0 = scmp.ne.s32.totalorder %s929_s20, %s925_s19 }
   0x9   : > { %p27_p1 = scmp.eq.s32.totalorder %s26_s26, 0  ;;  %p37_p2 = scmp.eq.s32.totalorder %s933_s21, 0 }
   0xa   : > { %p42_p3 = scmp.ne.s32.totalorder %s925_s19, %s921_s18  ;;  %p1218_p4 = scmp.eq.s32.totalorder %s998_s22, 0 }
   0xb   : > { %s1014_s27 = scalar_select %p27_p1, %s929_s20, %s29_s25  }
   0xc   : > { %p1016_p5 = por %p37_p2, %p36_p0  ;;  %p1022_p6 = por %p1218_p4, %p42_p3 }
   0xd   : > { %p150_p7 = scmp.eq.s32.totalorder %s998_s22, 1  ;;  %p156_p8 = scmp.eq.s32.totalorder %s615_s23, 1 }
   0xe   : > { %s1220_s29 = scalar_select %p1022_p6, 1, 0 }
   0xf   : > { %p616_p9 = scmp.ge.s32.totalorder %s933_s21, 1  ;;  %p163_p10 = scmp.lt.s32.totalorder %s933_s21, 3 }
  0x10   : > { %p1029_p11 = por %p150_p7, %p36_p0  ;;  %p1033_p12 = por %p156_p8, %p42_p3 }
  0x11   : > { %p1037_p13 = pnand %p616_p9, %p163_p10  ;;  %s935_s8 = smov [#allocation5]  }
  0x12   : > { %s1221_s30 = scalar_select %p1029_p11, 1, 0 }
  0x13   : > { %s1222_s6 = scalar_select %p1033_p12, 1, 0 }
  0x14   : > { %s1223_s7 = scalar_select %p1037_p13, 1, 0 }
  0x15   : > { %p745_p1 = pneg %p1037_p13  ;;  %s175_s9 = sshll.u32 %s935_s8, 4  ;;  %s176_s9 = int_to_ptr.vmem [resolvable:$true] %s175_s9 }
  0x16   : > { %p758_p3 = scmp.lt.s32.totalorder %s933_s21, 2  ;;  %s198_s11 = sand.u32 1, %s929_s20  }
  0x17   : > { %p1045_p2 = pnand %p745_p1, %p1218_p4  ;;  %s822_s12 = scalar_lea.vmem %s176_s9, 2048 }
  0x18   : > { %p823_p8 = scmp.ne.s32.totalorder %s176_s9, %s822_s12  ;;  %p830_p12 = scmp.lt.s32.totalorder %s176_s9, %s176_s9 }
  0x19   : > { %p813_p7 = pneg %p1045_p2  ;;  %p831_p11 = scmp.lt.s32.totalorder %s822_s12, %s822_s12 }
  0x1b   : > { %p825_p9 = pnand %p823_p8, %p813_p7  ;;  %p832_p6 = por %p831_p11, %p830_p12 }
  0x1d   : > { %p826_p10 = pneg %p825_p9 }
  0x1f   : > { %p833_p13 = pnand %p832_p6, %p826_p10 }
  0x21   : > { %836 = shalt.err (!%p833_p13)
}
  0x22   : > { %s1217_s13 = smov 128   ;;  %s937_s14 = smov 8  }
  0x23   : > { %748 = dma.hbm_to_vmem [thread:$0]  (!%p1045_p2), %s1209_s1, 2048, %s176_s9, [#allocation6], %s1217_s13, %s1217_s13, %s937_s14  }
  0x24   : > { %p1066_p1 = pnand %p758_p3, %p1016_p5  ;;  %s619_s23 = sshll.u32 %s198_s11, 4 }
  0x25   : > { %s620_s25 = sshll.u32 %s933_s21, 7  ;;  %s202_s12 = scalar_lea.vmem [#allocation2], %s619_s23 }
  0x26   : > { %s1074_s10 = scalar_lea.hbm %s1208_s0, %s620_s25  ;;  %s208_s15 = sshll.u32 %s202_s12, 4  ;;  %s1076_s15 = int_to_ptr.vmem [resolvable:$true] %s208_s15 }
  0x27   : > { %s1078_s28 = scalar_lea.sflag [#allocation3], %s198_s11  ;;  %s837_s9 = scalar_lea.hbm %s1074_s10, 256 }
  0x28   : > { %p838_p5 = scmp.ne.s32.totalorder %s1074_s10, %s837_s9  ;;  %p839_p6 = pneg %p1066_p1 }
  0x29   : > { %s842_s25 = scalar_lea.hbm %s1208_s0, 512  ;;  %p843_p13 = scmp.lt.s32.totalorder %s1074_s10, %s1208_s0 }
  0x2a   : > { %p840_p11 = pnand %p839_p6, %p838_p5  ;;  %p844_p2 = scmp.lt.s32.totalorder %s842_s25, %s837_s9 }
  0x2c   : > { %p841_p12 = pneg %p840_p11  ;;  %p845_p3 = por %p844_p2, %p843_p13 }
  0x2e   : > { %p846_p7 = pnand %p845_p3, %p841_p12 }
  0x30   : > { %849 = shalt.err (!%p846_p7)
}
  0x31   : > { %s850_s11 = scalar_lea.vmem %s1076_s15, 256  ;;  %s938_s23 = smov [#allocation2]  }
  0x32   : > { %p851_p8 = scmp.ne.s32.totalorder %s1076_s15, %s850_s11  ;;  %s855_s12 = sshll.u32 %s938_s23, 4  ;;  %s856_s12 = int_to_ptr.vmem [resolvable:$false] %s855_s12 }
  0x33   : > { %s857_s13 = scalar_lea.vmem %s856_s12, 512  ;;  %p858_p5 = scmp.lt.s32.totalorder %s1076_s15, %s856_s12 }
  0x34   : > { %p853_p9 = pnand %p851_p8, %p839_p6  ;;  %p859_p11 = scmp.lt.s32.totalorder %s857_s13, %s850_s11 }
  0x36   : > { %p854_p10 = pneg %p853_p9  ;;  %p860_p0 = por %p859_p11, %p858_p5 }
  0x38   : > { %p861_p4 = pnand %p860_p0, %p854_p10 }
  0x3a   : > { %864 = shalt.err (!%p861_p4)
}
  0x3b   : > { %s939_s9 = smov 256   ;;  %s1226_s16 = smov 128  }
  0x3c   : > { %752 = dma.hbm_to_vmem [thread:$0]  (!%p1066_p1), %s1074_s10, 256, %s1076_s15, %s1078_s28, %s939_s9, %s1226_s16, %s937_s14  }
  0x3d   : > { %p1227_p6 = scmp.ne.s32.totalorder %s1223_s7, 0 }
  0x3e   : > { %s1104_s25 = sand.u32 (!%p1227_p6), 1, %s925_s19   ;;  %p1228_p4 = scmp.ne.s32.totalorder (!%p1227_p6), %s1220_s29, 0 }
  0x3f   : > { %220 = sbr.rel (%p1227_p6) target bundleno = 518 (0x206), region = 40  ;;  %s622_s26 = sshll.u32 (!%p1227_p6), %s1104_s25, 4 }
  0x40   : > { %s223_s8 = scalar_lea.sflag (!%p1227_p6), [#allocation3], %s1104_s25  ;;  %s226_s17 = scalar_lea.vmem (!%p1227_p6), [#allocation2], %s622_s26 }
  0x44   : > { %908 = dma.done.wait (%p1228_p4), %s223_s8, 256  }
  0x45   : > { %910 = vsyncadd (%p1228_p4), %s223_s8, 4294967040  ;;  %p1229_p0 = scmp.eq.s32.totalorder %s998_s22, 0 }
  0x47   : > { %912 = dma.done.wait (%p1229_p0), [#allocation6], 2048   ;;  %p1230_p1 = pmov %p1229_p0 }
  0x48   : > { %v940_v0 = vmov 0.0   ;;  %vm941_vm0 = vmmov 0   ;;  %v274_v1 = vld [vmem:[#allocation5 + $0x78] sm:$0xff]  ;;  %v273_v2 = vld [vmem:[#allocation5 + $0x70] sm:$0xff]  ;;  %v272_v3 = vld [vmem:[#allocation5 + $0x68] sm:$0xff]  ;;  %v443_v29 = vlaneseq  ;;  %s629_s11 = sshll.u32 %s998_s22, 7 }
  0x49   : > { %914 = vsyncadd (%p1230_p1), [#allocation6], 4294965248  ;;  %702 = vmatprep.subr.mxu1 %v940_v0  ;;  %734 = vmatprep.mubr.msk.f32.mxu1 %vm941_vm0, %v940_v0  ;;  %v271_v4 = vld [vmem:[#allocation5 + $0x60] sm:$0xff]  ;;  %v1122_v6 = vld [vmem:[%s226_s17 + $0x8] sm:$0xff]  ;;  %v942_v27 = vmov 1966171168   ;;  %s1163_s16 = scalar_lea.hbm %s1213_s5, %s629_s11 }
  0x4a   : > { %667 = vmatprep.subr.mxu0 %v274_v1  ;;  %703 = vmatpush3.msra.mxu1 %v274_v1  ;;  %v257_v5 = vld [vmem:[%s226_s17] sm:$0xff]  ;;  %v270_v7 = vld [vmem:[#allocation5 + $0x58] sm:$0xff]  ;;  %v276_v9 = vmul.f32 %v1122_v6, %v1122_v6  ;;  %v268_v12 = vld [vmem:[#allocation5 + $0x48] sm:$0xff]  ;;  %v441_v28 = vunpack.c.l.s4 %v942_v27  ;;  %v444_v31 = vshrl.u32 %v443_v29, 7  ;;  %s256_s23 = scalar_lea.vmem [#allocation7], %s622_s26  ;;  %s520_s22 = scalar_lea.sflag [#allocation4], %s1104_s25 }
  0x4b   : > { %668 = vmatpush3.msra.mxu0 %v274_v1  ;;  %704 = vmatprep.subr.mxu1 %v940_v0  ;;  %v275_v8 = vmul.f32 %v257_v5, %v257_v5  ;;  %v269_v10 = vld [vmem:[#allocation5 + $0x50] sm:$0xff]  ;;  %v267_v13 = vld [vmem:[#allocation5 + $0x40] sm:$0xff]  ;;  %v266_v14 = vld [vmem:[#allocation5 + $0x38] sm:$0xff]  ;;  %s532_s12 = sshll.u32 %s256_s23, 4  ;;  %p1231_p13 = scmp.ne.s32.totalorder %s1221_s30, 0  ;;  %s1165_s12 = int_to_ptr.vmem [resolvable:$true] %s532_s12 }
  0x4c   : > { %669 = vmatprep.subr.mxu0 %v273_v2  ;;  %705 = vmatpush3.msra.mxu1 %v273_v2  ;;  %v265_v15 = vld [vmem:[#allocation5 + $0x30] sm:$0xff]  ;;  %v264_v16 = vld [vmem:[#allocation5 + $0x28] sm:$0xff]  ;;  %v263_v17 = vld [vmem:[#allocation5 + $0x20] sm:$0xff]  ;;  %v442_v30 = vunpack.c.0.s8 %v441_v28  ;;  %v456_v36 = vsub.s32 0, %v444_v31  ;;  %s865_s8 = scalar_lea.vmem %s1165_s12, 256  ;;  %s943_s26 = smov [#allocation7]  }
  0x4d   : > { %670 = vmatpush3.msra.mxu0 %v273_v2  ;;  %706 = vmatprep.subr.mxu1 %v940_v0  ;;  %v1128_v11 = vadd.f32 %v276_v9, %v275_v8  ;;  %v262_v18 = vld [vmem:[#allocation5 + $0x18] sm:$0xff]  ;;  %v261_v20 = vld [vmem:[#allocation5 + $0x10] sm:$0xff]  ;;  %v260_v22 = vld [vmem:[#allocation5 + $0x8] sm:$0xff]  ;;  %p866_p12 = scmp.ne.s32.totalorder %s1165_s12, %s865_s8  ;;  %s869_s17 = sshll.u32 %s943_s26, 4  ;;  %s870_s17 = int_to_ptr.vmem [resolvable:$false] %s869_s17 }
  0x4e   : > { %671 = vmatprep.subr.mxu0 %v272_v3  ;;  %707 = vmatpush3.msra.mxu1 %v272_v3  ;;  %v259_v25 = vld [vmem:[#allocation5] sm:$0xff]  ;;  %v445_v34 = vsub.s32 %v442_v30, %v444_v31  ;;  %s871_s29 = scalar_lea.vmem %s870_s17, 512  ;;  %p872_p7 = scmp.lt.s32.totalorder %s1165_s12, %s870_s17 }
  0x4f   : > { %672 = vmatpush3.msra.mxu0 %v272_v3  ;;  %708 = vmatprep.subr.mxu1 %v940_v0  ;;  %803 = vrsqrt.f32 %v1128_v11  ;;  %vm280_vm1 = vcmp.eq.f32.partialorder %v1128_v11, inf  ;;  %v283_v23 = vand.u32 2147483648, %v1128_v11  ;;  %vm282_vm2 = vcmp.eq.f32.partialorder %v1128_v11, 0.0  ;;  %v627_v9 = vld [vmem:[%s1212_s4] ss:$0 sm:$0xff]  ;;  %p867_p2 = pnand %p866_p12, %p1231_p13  ;;  %p873_p8 = scmp.lt.s32.totalorder %s871_s29, %s865_s8 }
  0x50   : > { %673 = vmatprep.subr.mxu0 %v271_v4  ;;  %709 = vmatpush3.msra.mxu1 %v271_v4  ;;  %v625_v32 = vld.sshfl [vmem:[%s1210_s2] sm:$0x11 pattern:$0x75316420] }
  0x51   : > { %674 = vmatpush3.msra.mxu0 %v271_v4  ;;  %710 = vmatprep.subr.mxu1 %v940_v0  ;;  %v439_v33 = vcombine.high %v625_v32, %v625_v32  ;;  %v446_v37 = vrot.slane %v625_v32, %v445_v34  ;;  %p868_p3 = pneg %p867_p2  ;;  %p874_p9 = por %p873_p8, %p872_p7 }
  0x52   : > { %675 = vmatprep.subr.mxu0 %v270_v7  ;;  %699 = vmatprep.mubr.f32.mxu0 %v257_v5 }
  0x53   : > { %676 = vmatpush3.msra.mxu0 %v270_v7  ;;  %711 = vmatpush3.msra.mxu1 %v270_v7  ;;  %v453_v35 = vrot.slane %v439_v33, %v445_v34  ;;  %v457_v39 = vrot.slane %v446_v37, %v456_v36  ;;  %v626_v7 = vld [vmem:[%s1211_s3] ss:$0 sm:$0xff]  ;;  %p875_p10 = pnand %p874_p9, %p868_p3 }
  0x54   : > { %677 = vmatprep.subr.mxu0 %v269_v10  ;;  %712 = vmatprep.subr.mxu1 %v940_v0 }
  0x55   : > { %678 = vmatpush3.msra.mxu0 %v269_v10  ;;  %713 = vmatpush3.msra.mxu1 %v269_v10  ;;  %v461_v38 = vrot.slane %v453_v35, %v456_v36 }
  0x56   : > { %679 = vmatprep.subr.mxu0 %v268_v12  ;;  %714 = vmatprep.subr.mxu1 %v940_v0 }
  0x57   : > { %680 = vmatpush3.msra.mxu0 %v268_v12  ;;  %715 = vmatpush3.msra.mxu1 %v268_v12 }
  0x58   : > { %681 = vmatprep.subr.mxu0 %v267_v13  ;;  %716 = vmatprep.subr.mxu1 %v940_v0 }
  0x59   : > { %682 = vmatpush3.msra.mxu0 %v267_v13  ;;  %717 = vmatpush3.msra.mxu1 %v267_v13 }
  0x5a   : > { %683 = vmatprep.subr.mxu0 %v266_v14  ;;  %718 = vmatprep.subr.mxu1 %v940_v0 }
  0x5b   : > { %684 = vmatpush3.msra.mxu0 %v266_v14  ;;  %719 = vmatpush3.msra.mxu1 %v266_v14 }
  0x5c   : > { %685 = vmatprep.subr.mxu0 %v265_v15  ;;  %720 = vmatprep.subr.mxu1 %v940_v0  ;;  %v804_v19 = vpop.eup %803 }
  0x5d   : > { %686 = vmatpush3.msra.mxu0 %v265_v15  ;;  %721 = vmatpush3.msra.mxu1 %v265_v15  ;;  %v279_v21 = vmul.f32 %v804_v19, %v1128_v11 }
  0x5e   : > { %687 = vmatprep.subr.mxu0 %v264_v16  ;;  %722 = vmatprep.subr.mxu1 %v940_v0 }
  0x5f   : > { %688 = vmatpush3.msra.mxu0 %v264_v16  ;;  %723 = vmatpush3.msra.mxu1 %v264_v16  ;;  %v281_v24 = vsel %vm280_vm1, %v1128_v11, %v279_v21 }
  0x60   : > { %689 = vmatprep.subr.mxu0 %v263_v17  ;;  %724 = vmatprep.subr.mxu1 %v940_v0  ;;  %v284_v26 = vsel %vm282_vm2, %v283_v23, %v281_v24 }
  0x61   : > { %690 = vmatpush3.msra.mxu0 %v263_v17  ;;  %725 = vmatpush3.msra.mxu1 %v263_v17 }
  0x62   : > { %691 = vmatprep.subr.mxu0 %v262_v18  ;;  %726 = vmatprep.subr.mxu1 %v940_v0 }
  0x63   : > { %692 = vmatpush3.msra.mxu0 %v262_v18  ;;  %727 = vmatpush3.msra.mxu1 %v262_v18 }
  0x64   : > { %693 = vmatprep.subr.mxu0 %v261_v20  ;;  %728 = vmatprep.subr.mxu1 %v940_v0 }
  0x65   : > { %694 = vmatpush3.msra.mxu0 %v261_v20  ;;  %729 = vmatpush3.msra.mxu1 %v261_v20 }
  0x66   : > { %695 = vmatprep.subr.mxu0 %v260_v22  ;;  %730 = vmatprep.subr.mxu1 %v940_v0 }
  0x67   : > { %696 = vmatpush3.msra.mxu0 %v260_v22  ;;  %731 = vmatpush3.msra.mxu1 %v260_v22 }
  0x68   : > { %697 = vmatprep.subr.mxu0 %v259_v25  ;;  %732 = vmatprep.subr.mxu1 %v940_v0 }
  0x69   : > { %698 = vmatpush3.msra.mxu0 %v259_v25  ;;  %733 = vmatpush3.msra.mxu1 %v259_v25 }
  0x6a   : > { %700 = vmatmul.mubr.f32.vlgmr.msra.gmra.mxu0 %v1122_v6  ;;  %735 = vmatmul.mubr.f32.vlgmr.msra.gmra.mxu1 %v284_v26 }
 0x12a   : > { %v701_v40 = vpop.f32.mrf.mxu0  ;;  %v426_v41 = vpop.f32.mrf.mxu1 }
 0x12b   : > { %v465_v42 = vadd.f32 %v701_v40, %v461_v38  ;;  %v467_v45 = vmul.f32 %v701_v40, %v701_v40 }
 0x12c   : > { %v351_v43 = vpop.f32.mrf.mxu0  ;;  %v736_v44 = vpop.f32.mrf.mxu1 }
 0x12d   : > { %v464_v46 = vadd.f32 %v457_v39, %v351_v43  ;;  %v466_v47 = vmul.f32 %v351_v43, %v351_v43  ;;  %v510_v48 = vmul.f32 %v465_v42, %v465_v42 }
 0x12f   : > { %v468_v49 = vadd.f32 %v467_v45, %v466_v47  ;;  %v509_v50 = vmul.f32 %v464_v46, %v464_v46 }
 0x131   : > { %805 = vrsqrt.f32 %v468_v49  ;;  %v511_v51 = vadd.f32 %v510_v48, %v509_v50  ;;  %vm471_vm3 = vcmp.eq.f32.partialorder %v468_v49, inf  ;;  %v474_v54 = vand.u32 2147483648, %v468_v49 }
 0x132   : > { %vm473_vm4 = vcmp.eq.f32.partialorder %v468_v49, 0.0 }
 0x133   : > { %v512_v4 = vmax.f32 %v511_v51, 1e-16 }
 0x13e   : > { %v806_v52 = vpop.eup %805 }
 0x13f   : > { %v470_v53 = vmul.f32 %v806_v52, %v468_v49 }
 0x141   : > { %v472_v55 = vsel %vm471_vm3, %v468_v49, %v470_v53 }
 0x142   : > { %v475_v56 = vsel %vm473_vm4, %v474_v54, %v472_v55 }
 0x143   : > { %v476_v57 = vadd.f32 %v475_v56, %v426_v41 }
 0x145   : > { %v477_v58 = vmul.f32 0.5, %v476_v57 }
 0x147   : > { %478 = vadd.xlane.f32.xlu0 %v477_v58  ;;  %v481_v59 = vmul.f32 %v477_v58, %v477_v58 }
 0x14b   : > { %482 = vadd.xlane.f32.xlu0 %v481_v59 }
 0x1d0   : > { %v479_v60 = vpop.xlane.xlu0 %478 }
 0x1d1   : > { %v480_v61 = vmul.f32 0.03125, %v479_v60 }
 0x1d3   : > { %v485_v63 = vmul.f32 %v480_v61, %v480_v61  ;;  %v488_v5 = vsub.f32 %v477_v58, %v480_v61 }
 0x1d4   : > { %v483_v62 = vpop.xlane.xlu0 %482 }
 0x1d5   : > { %v484_v0 = vmul.f32 0.03125, %v483_v62 }
 0x1d7   : > { %v486_v1 = vsub.f32 %v484_v0, %v485_v63 }
 0x1d9   : > { %v487_v2 = vmax.f32 %v486_v1, 0.0 }
 0x1db   : > { %v489_v3 = vadd.f32 1e-05, %v487_v2 }
 0x1dd   : > { %807 = vrsqrt.f32 %v489_v3 }
 0x1de   : > { %809 = vrsqrt.f32 %v512_v4 }
 0x1ea   : > { %v808_v6 = vpop.eup %807 }
 0x1eb   : > { %v491_v8 = vmul.f32 %v808_v6, %v488_v5  ;;  %v810_v13 = vpop.eup %809 }
 0x1ed   : > { %v499_v10 = vmul.f32 %v626_v7, %v491_v8 }
 0x1ef   : > { %v507_v11 = vadd.f32 %v627_v9, %v499_v10 }
 0x1f1   : > { %v508_v12 = vmax.f32 %v507_v11, 0.0 }
 0x1f3   : > { %v514_v14 = vmul.f32 %v810_v13, %v508_v12 }
 0x1f5   : > { %v515_v15 = vmul.f32 %v514_v14, %v464_v46  ;;  %v516_v16 = vmul.f32 %v514_v14, %v465_v42 }
 0x1f7   : > { %517 = vst [vmem:[%s256_s23] sm:$0xff] %v515_v15  ;;  %518 = vst [vmem:[%s256_s23 + $0x8] sm:$0xff] %v516_v16 }
 0x1f8   : > { %878 = shalt.err (!%p875_p10)
}
 0x1f9   : > { %s879_s7 = scalar_lea.hbm %s1163_s16, 256  ;;  %s883_s15 = scalar_lea.hbm %s1213_s5, 512 }
 0x1fa   : > { %p880_p5 = scmp.ne.s32.totalorder %s1163_s16, %s879_s7  ;;  %p884_p4 = scmp.lt.s32.totalorder %s1163_s16, %s1213_s5 }
 0x1fb   : > { %p885_p0 = scmp.lt.s32.totalorder %s883_s15, %s879_s7 }
 0x1fc   : > { %p881_p11 = pnand %p880_p5, %p1231_p13 }
 0x1fd   : > { %p886_p1 = por %p885_p0, %p884_p4 }
 0x1fe   : > { %p882_p6 = pneg %p881_p11 }
 0x200   : > { %p887_p12 = pnand %p886_p1, %p882_p6 }
 0x202   : > { %890 = shalt.err (!%p887_p12)
}
 0x203   : > { %s944_s23 = smov 128   ;;  %s945_s13 = smov 256  }
 0x204   : > { %s946_s9 = smov 8  }
 0x205   : > { %743 = dma.vmem_to_hbm [thread:$0]  (%p1231_p13), %s1165_s12, 256, %s1163_s16, %s520_s22, %s944_s23, %s945_s13, %s946_s9  }
 0x206 PF: > { %s547_s8 = sand.u32 1, %s921_s18   ;;  %p1232_p2 = scmp.ne.s32.totalorder %s1222_s6, 0 }
 0x207   : > { %p1233_p3 = scmp.ge.s32.totalorder %s933_s21, 2  ;;  %s548_s26 = scalar_lea.sflag [#allocation4], %s547_s8 }
 0x209   : > { %p754_p7 = pnand %p1233_p3, %p1232_p2 }
 0x20b   : > { %p755_p8 = pneg %p754_p7 }
 0x20d   : > { %916 = dma.done.wait (%p755_p8), %s548_s26, 256  }
 0x20e   : > { %918 = vsyncadd (%p755_p8), %s548_s26, 4294967040  ;;  %p19_p9 = scmp.ge.s32.totalorder %s1002_s24, 4   ;;  %s1234_s18 = smov %s925_s19 }
 0x20f   : > { %s1235_s19 = smov %s929_s20  ;;  %s1236_s20 = smov %s1014_s27 }
 0x210   : > { %s1237_s21 = smov %s1002_s24  ;;  %21 = sbr.rel (!%p19_p9) target bundleno = 6 (0x6), region = 89 }
 0x215   :  { %553 = vsyncpa [#allocation3], 1 }
 0x216   :  { %555 = vsyncpa [#allocation3 + $0x1], 1 }
 0x217   :  { %556 = vsyncpa [#allocation6], 1 }
 0x218   :  { %557 = vsyncpa [#allocation4], 1 }
 0x219   :  { %559 = vsyncpa [#allocation4 + $0x1], 1 }

// kernel: tpu_custom_call.1
= control target key start
LH: loop header
LB: loop body
LE: loop exit
PB: predicated region body
PF: predicated region fallthrough
CT: control target
= control target key end

     0   :  { %10 = vsyncpa [#allocation3], 0  ;;  %s1208_s0 = inlined_call_operand.hbm [shape: f32[2,16,128], index: 0, kind: input, shape index: {}]   ;;  %s1209_s1 = inlined_call_operand.hbm [shape: f32[128,128], index: 1, kind: input, shape index: {}]   ;;  %s1210_s2 = inlined_call_operand.vmem [shape: f32[2,128], index: 2, kind: input, shape index: {}]   ;;  %s1211_s3 = inlined_call_operand.vmem [shape: f32[1,128], index: 3, kind: input, shape index: {}]   ;;  %s1212_s4 = inlined_call_operand.vmem [shape: f32[1,128], index: 4, kind: input, shape index: {}]   ;;  %s1213_s5 = inlined_call_operand.hbm [shape: f32[2,16,128], index: 5, kind: output, shape index: {}]  }
   0x1   :  { %12 = vsyncpa [#allocation3 + $0x1], 0 }
   0x2   :  { %13 = vsyncpa [#allocation6], 0 }
   0x3   :  { %14 = vsyncpa [#allocation4], 0 }
   0x4   :  { %16 = vsyncpa [#allocation4 + $0x1], 0  ;;  %s977_s18 = smov 0   ;;  %s979_s19 = smov 0  }
   0x5   :  { %s981_s20 = smov 0   ;;  %s983_s21 = smov 0  }
   0x6 LB: > { %s998_s22 = sadd.s32 4294967295, %s933_s21   ;;  %s615_s23 = sadd.s32 4294967294, %s933_s21   ;;  %s933_s21 = sphi %s983_s21, %s1237_s21   ;;  %s929_s20 = sphi %s981_s20, %s1236_s20   ;;  %s925_s19 = sphi %s979_s19, %s1235_s19   ;;  %s921_s18 = sphi %s977_s18, %s1234_s18  }
   0x7   : > { %s1002_s24 = sadd.s32 1, %s933_s21   ;;  %s29_s25 = sadd.s32 1, %s929_s20 }
   0x8   : > { %s26_s26 = ssub.s32 %s933_s21, %s1002_s24  ;;  %p36_p0 = scmp.ne.s32.totalorder %s929_s20, %s925_s19 }
   0x9   : > { %p27_p1 = scmp.eq.s32.totalorder %s26_s26, 0  ;;  %p37_p2 = scmp.eq.s32.totalorder %s933_s21, 0 }
   0xa   : > { %p42_p3 = scmp.ne.s32.totalorder %s925_s19, %s921_s18  ;;  %p1218_p4 = scmp.eq.s32.totalorder %s998_s22, 0 }
   0xb   : > { %s1014_s27 = scalar_select %p27_p1, %s929_s20, %s29_s25  }
   0xc   : > { %p1016_p5 = por %p37_p2, %p36_p0  ;;  %p1022_p6 = por %p1218_p4, %p42_p3 }
   0xd   : > { %p150_p7 = scmp.eq.s32.totalorder %s998_s22, 1  ;;  %p156_p8 = scmp.eq.s32.totalorder %s615_s23, 1 }
   0xe   : > { %s1220_s29 = scalar_select %p1022_p6, 1, 0 }
   0xf   : > { %p616_p9 = scmp.ge.s32.totalorder %s933_s21, 1  ;;  %p163_p10 = scmp.lt.s32.totalorder %s933_s21, 3 }
  0x10   : > { %p1029_p11 = por %p150_p7, %p36_p0  ;;  %p1033_p12 = por %p156_p8, %p42_p3 }
  0x11   : > { %p1037_p13 = pnand %p616_p9, %p163_p10  ;;  %s935_s8 = smov [#allocation5]  }
  0x12   : > { %s1221_s30 = scalar_select %p1029_p11, 1, 0 }
  0x13   : > { %s1222_s6 = scalar_select %p1033_p12, 1, 0 }
  0x14   : > { %s1223_s7 = scalar_select %p1037_p13, 1, 0 }
  0x15   : > { %p745_p1 = pneg %p1037_p13  ;;  %s175_s9 = sshll.u32 %s935_s8, 4  ;;  %s176_s9 = int_to_ptr.vmem [resolvable:$true] %s175_s9 }
  0x16   : > { %p758_p3 = scmp.lt.s32.totalorder %s933_s21, 2  ;;  %s198_s11 = sand.u32 1, %s929_s20  }
  0x17   : > { %p1045_p2 = pnand %p745_p1, %p1218_p4  ;;  %s822_s12 = scalar_lea.vmem %s176_s9, 2048 }
  0x18   : > { %p823_p8 = scmp.ne.s32.totalorder %s176_s9, %s822_s12  ;;  %p830_p12 = scmp.lt.s32.totalorder %s176_s9, %s176_s9 }
  0x19   : > { %p813_p7 = pneg %p1045_p2  ;;  %p831_p11 = scmp.lt.s32.totalorder %s822_s12, %s822_s12 }
  0x1b   : > { %p825_p9 = pnand %p823_p8, %p813_p7  ;;  %p832_p6 = por %p831_p11, %p830_p12 }
  0x1d   : > { %p826_p10 = pneg %p825_p9 }
  0x1f   : > { %p833_p13 = pnand %p832_p6, %p826_p10 }
  0x21   : > { %836 = shalt.err (!%p833_p13)
}
  0x22   : > { %s1217_s13 = smov 128   ;;  %s937_s14 = smov 8  }
  0x23   : > { %748 = dma.hbm_to_vmem [thread:$0]  (!%p1045_p2), %s1209_s1, 2048, %s176_s9, [#allocation6], %s1217_s13, %s1217_s13, %s937_s14  }
  0x24   : > { %p1066_p1 = pnand %p758_p3, %p1016_p5  ;;  %s619_s23 = sshll.u32 %s198_s11, 4 }
  0x25   : > { %s620_s25 = sshll.u32 %s933_s21, 7  ;;  %s202_s12 = scalar_lea.vmem [#allocation2], %s619_s23 }
  0x26   : > { %s1074_s10 = scalar_lea.hbm %s1208_s0, %s620_s25  ;;  %s208_s15 = sshll.u32 %s202_s12, 4  ;;  %s1076_s15 = int_to_ptr.vmem [resolvable:$true] %s208_s15 }
  0x27   : > { %s1078_s28 = scalar_lea.sflag [#allocation3], %s198_s11  ;;  %s837_s9 = scalar_lea.hbm %s1074_s10, 256 }
  0x28   : > { %p838_p5 = scmp.ne.s32.totalorder %s1074_s10, %s837_s9  ;;  %p839_p6 = pneg %p1066_p1 }
  0x29   : > { %s842_s25 = scalar_lea.hbm %s1208_s0, 512  ;;  %p843_p13 = scmp.lt.s32.totalorder %s1074_s10, %s1208_s0 }
  0x2a   : > { %p840_p11 = pnand %p839_p6, %p838_p5  ;;  %p844_p2 = scmp.lt.s32.totalorder %s842_s25, %s837_s9 }
  0x2c   : > { %p841_p12 = pneg %p840_p11  ;;  %p845_p3 = por %p844_p2, %p843_p13 }
  0x2e   : > { %p846_p7 = pnand %p845_p3, %p841_p12 }
  0x30   : > { %849 = shalt.err (!%p846_p7)
}
  0x31   : > { %s850_s11 = scalar_lea.vmem %s1076_s15, 256  ;;  %s938_s23 = smov [#allocation2]  }
  0x32   : > { %p851_p8 = scmp.ne.s32.totalorder %s1076_s15, %s850_s11  ;;  %s855_s12 = sshll.u32 %s938_s23, 4  ;;  %s856_s12 = int_to_ptr.vmem [resolvable:$false] %s855_s12 }
  0x33   : > { %s857_s13 = scalar_lea.vmem %s856_s12, 512  ;;  %p858_p5 = scmp.lt.s32.totalorder %s1076_s15, %s856_s12 }
  0x34   : > { %p853_p9 = pnand %p851_p8, %p839_p6  ;;  %p859_p11 = scmp.lt.s32.totalorder %s857_s13, %s850_s11 }
  0x36   : > { %p854_p10 = pneg %p853_p9  ;;  %p860_p0 = por %p859_p11, %p858_p5 }
  0x38   : > { %p861_p4 = pnand %p860_p0, %p854_p10 }
  0x3a   : > { %864 = shalt.err (!%p861_p4)
}
  0x3b   : > { %s939_s9 = smov 256   ;;  %s1226_s16 = smov 128  }
  0x3c   : > { %752 = dma.hbm_to_vmem [thread:$0]  (!%p1066_p1), %s1074_s10, 256, %s1076_s15, %s1078_s28, %s939_s9, %s1226_s16, %s937_s14  }
  0x3d   : > { %p1227_p6 = scmp.ne.s32.totalorder %s1223_s7, 0 }
  0x3e   : > { %s1104_s25 = sand.u32 (!%p1227_p6), 1, %s925_s19   ;;  %p1228_p4 = scmp.ne.s32.totalorder (!%p1227_p6), %s1220_s29, 0 }
  0x3f   : > { %220 = sbr.rel (%p1227_p6) target bundleno = 518 (0x206), region = 40  ;;  %s622_s26 = sshll.u32 (!%p1227_p6), %s1104_s25, 4 }
  0x40   : > { %s223_s8 = scalar_lea.sflag (!%p1227_p6), [#allocation3], %s1104_s25  ;;  %s226_s17 = scalar_lea.vmem (!%p1227_p6), [#allocation2], %s622_s26 }
  0x44   : > { %908 = dma.done.wait (%p1228_p4), %s223_s8, 256  }
  0x45   : > { %910 = vsyncadd (%p1228_p4), %s223_s8, 4294967040  ;;  %p1229_p0 = scmp.eq.s32.totalorder %s998_s22, 0 }
  0x47   : > { %912 = dma.done.wait (%p1229_p0), [#allocation6], 2048   ;;  %p1230_p1 = pmov %p1229_p0 }
  0x48   : > { %v940_v0 = vmov 0.0   ;;  %vm941_vm0 = vmmov 0   ;;  %v274_v1 = vld [vmem:[#allocation5 + $0x78] sm:$0xff]  ;;  %v273_v2 = vld [vmem:[#allocation5 + $0x70] sm:$0xff]  ;;  %v272_v3 = vld [vmem:[#allocation5 + $0x68] sm:$0xff]  ;;  %v443_v29 = vlaneseq  ;;  %s629_s11 = sshll.u32 %s998_s22, 7 }
  0x49   : > { %914 = vsyncadd (%p1230_p1), [#allocation6], 4294965248  ;;  %702 = vmatprep.subr.mxu1 %v940_v0  ;;  %734 = vmatprep.mubr.msk.f32.mxu1 %vm941_vm0, %v940_v0  ;;  %v271_v4 = vld [vmem:[#allocation5 + $0x60] sm:$0xff]  ;;  %v1122_v6 = vld [vmem:[%s226_s17 + $0x8] sm:$0xff]  ;;  %v942_v27 = vmov 1966171168   ;;  %s1163_s16 = scalar_lea.hbm %s1213_s5, %s629_s11 }
  0x4a   : > { %667 = vmatprep.subr.mxu0 %v274_v1  ;;  %703 = vmatpush3.msra.mxu1 %v274_v1  ;;  %v257_v5 = vld [vmem:[%s226_s17] sm:$0xff]  ;;  %v270_v7 = vld [vmem:[#allocation5 + $0x58] sm:$0xff]  ;;  %v276_v9 = vmul.f32 %v1122_v6, %v1122_v6  ;;  %v268_v12 = vld [vmem:[#allocation5 + $0x48] sm:$0xff]  ;;  %v441_v28 = vunpack.c.l.s4 %v942_v27  ;;  %v444_v31 = vshrl.u32 %v443_v29, 7  ;;  %s256_s23 = scalar_lea.vmem [#allocation7], %s622_s26  ;;  %s520_s22 = scalar_lea.sflag [#allocation4], %s1104_s25 }
  0x4b   : > { %668 = vmatpush3.msra.mxu0 %v274_v1  ;;  %704 = vmatprep.subr.mxu1 %v940_v0  ;;  %v275_v8 = vmul.f32 %v257_v5, %v257_v5  ;;  %v269_v10 = vld [vmem:[#allocation5 + $0x50] sm:$0xff]  ;;  %v267_v13 = vld [vmem:[#allocation5 + $0x40] sm:$0xff]  ;;  %v266_v14 = vld [vmem:[#allocation5 + $0x38] sm:$0xff]  ;;  %s532_s12 = sshll.u32 %s256_s23, 4  ;;  %p1231_p13 = scmp.ne.s32.totalorder %s1221_s30, 0  ;;  %s1165_s12 = int_to_ptr.vmem [resolvable:$true] %s532_s12 }
  0x4c   : > { %669 = vmatprep.subr.mxu0 %v273_v2  ;;  %705 = vmatpush3.msra.mxu1 %v273_v2  ;;  %v265_v15 = vld [vmem:[#allocation5 + $0x30] sm:$0xff]  ;;  %v264_v16 = vld [vmem:[#allocation5 + $0x28] sm:$0xff]  ;;  %v263_v17 = vld [vmem:[#allocation5 + $0x20] sm:$0xff]  ;;  %v442_v30 = vunpack.c.0.s8 %v441_v28  ;;  %v456_v36 = vsub.s32 0, %v444_v31  ;;  %s865_s8 = scalar_lea.vmem %s1165_s12, 256  ;;  %s943_s26 = smov [#allocation7]  }
  0x4d   : > { %670 = vmatpush3.msra.mxu0 %v273_v2  ;;  %706 = vmatprep.subr.mxu1 %v940_v0  ;;  %v1128_v11 = vadd.f32 %v276_v9, %v275_v8  ;;  %v262_v18 = vld [vmem:[#allocation5 + $0x18] sm:$0xff]  ;;  %v261_v20 = vld [vmem:[#allocation5 + $0x10] sm:$0xff]  ;;  %v260_v22 = vld [vmem:[#allocation5 + $0x8] sm:$0xff]  ;;  %p866_p12 = scmp.ne.s32.totalorder %s1165_s12, %s865_s8  ;;  %s869_s17 = sshll.u32 %s943_s26, 4  ;;  %s870_s17 = int_to_ptr.vmem [resolvable:$false] %s869_s17 }
  0x4e   : > { %671 = vmatprep.subr.mxu0 %v272_v3  ;;  %707 = vmatpush3.msra.mxu1 %v272_v3  ;;  %v259_v25 = vld [vmem:[#allocation5] sm:$0xff]  ;;  %v445_v34 = vsub.s32 %v442_v30, %v444_v31  ;;  %s871_s29 = scalar_lea.vmem %s870_s17, 512  ;;  %p872_p7 = scmp.lt.s32.totalorder %s1165_s12, %s870_s17 }
  0x4f   : > { %672 = vmatpush3.msra.mxu0 %v272_v3  ;;  %708 = vmatprep.subr.mxu1 %v940_v0  ;;  %803 = vrsqrt.f32 %v1128_v11  ;;  %vm280_vm1 = vcmp.eq.f32.partialorder %v1128_v11, inf  ;;  %v283_v23 = vand.u32 2147483648, %v1128_v11  ;;  %vm282_vm2 = vcmp.eq.f32.partialorder %v1128_v11, 0.0  ;;  %v627_v9 = vld [vmem:[%s1212_s4] ss:$0 sm:$0xff]  ;;  %p867_p2 = pnand %p866_p12, %p1231_p13  ;;  %p873_p8 = scmp.lt.s32.totalorder %s871_s29, %s865_s8 }
  0x50   : > { %673 = vmatprep.subr.mxu0 %v271_v4  ;;  %709 = vmatpush3.msra.mxu1 %v271_v4  ;;  %v625_v32 = vld.sshfl [vmem:[%s1210_s2] sm:$0x11 pattern:$0x75316420] }
  0x51   : > { %674 = vmatpush3.msra.mxu0 %v271_v4  ;;  %710 = vmatprep.subr.mxu1 %v940_v0  ;;  %v439_v33 = vcombine.high %v625_v32, %v625_v32  ;;  %v446_v37 = vrot.slane %v625_v32, %v445_v34  ;;  %p868_p3 = pneg %p867_p2  ;;  %p874_p9 = por %p873_p8, %p872_p7 }
  0x52   : > { %675 = vmatprep.subr.mxu0 %v270_v7  ;;  %699 = vmatprep.mubr.f32.mxu0 %v257_v5 }
  0x53   : > { %676 = vmatpush3.msra.mxu0 %v270_v7  ;;  %711 = vmatpush3.msra.mxu1 %v270_v7  ;;  %v453_v35 = vrot.slane %v439_v33, %v445_v34  ;;  %v457_v39 = vrot.slane %v446_v37, %v456_v36  ;;  %v626_v7 = vld [vmem:[%s1211_s3] ss:$0 sm:$0xff]  ;;  %p875_p10 = pnand %p874_p9, %p868_p3 }
  0x54   : > { %677 = vmatprep.subr.mxu0 %v269_v10  ;;  %712 = vmatprep.subr.mxu1 %v940_v0 }
  0x55   : > { %678 = vmatpush3.msra.mxu0 %v269_v10  ;;  %713 = vmatpush3.msra.mxu1 %v269_v10  ;;  %v461_v38 = vrot.slane %v453_v35, %v456_v36 }
  0x56   : > { %679 = vmatprep.subr.mxu0 %v268_v12  ;;  %714 = vmatprep.subr.mxu1 %v940_v0 }
  0x57   : > { %680 = vmatpush3.msra.mxu0 %v268_v12  ;;  %715 = vmatpush3.msra.mxu1 %v268_v12 }
  0x58   : > { %681 = vmatprep.subr.mxu0 %v267_v13  ;;  %716 = vmatprep.subr.mxu1 %v940_v0 }
  0x59   : > { %682 = vmatpush3.msra.mxu0 %v267_v13  ;;  %717 = vmatpush3.msra.mxu1 %v267_v13 }
  0x5a   : > { %683 = vmatprep.subr.mxu0 %v266_v14  ;;  %718 = vmatprep.subr.mxu1 %v940_v0 }
  0x5b   : > { %684 = vmatpush3.msra.mxu0 %v266_v14  ;;  %719 = vmatpush3.msra.mxu1 %v266_v14 }
  0x5c   : > { %685 = vmatprep.subr.mxu0 %v265_v15  ;;  %720 = vmatprep.subr.mxu1 %v940_v0  ;;  %v804_v19 = vpop.eup %803 }
  0x5d   : > { %686 = vmatpush3.msra.mxu0 %v265_v15  ;;  %721 = vmatpush3.msra.mxu1 %v265_v15  ;;  %v279_v21 = vmul.f32 %v804_v19, %v1128_v11 }
  0x5e   : > { %687 = vmatprep.subr.mxu0 %v264_v16  ;;  %722 = vmatprep.subr.mxu1 %v940_v0 }
  0x5f   : > { %688 = vmatpush3.msra.mxu0 %v264_v16  ;;  %723 = vmatpush3.msra.mxu1 %v264_v16  ;;  %v281_v24 = vsel %vm280_vm1, %v1128_v11, %v279_v21 }
  0x60   : > { %689 = vmatprep.subr.mxu0 %v263_v17  ;;  %724 = vmatprep.subr.mxu1 %v940_v0  ;;  %v284_v26 = vsel %vm282_vm2, %v283_v23, %v281_v24 }
  0x61   : > { %690 = vmatpush3.msra.mxu0 %v263_v17  ;;  %725 = vmatpush3.msra.mxu1 %v263_v17 }
  0x62   : > { %691 = vmatprep.subr.mxu0 %v262_v18  ;;  %726 = vmatprep.subr.mxu1 %v940_v0 }
  0x63   : > { %692 = vmatpush3.msra.mxu0 %v262_v18  ;;  %727 = vmatpush3.msra.mxu1 %v262_v18 }
  0x64   : > { %693 = vmatprep.subr.mxu0 %v261_v20  ;;  %728 = vmatprep.subr.mxu1 %v940_v0 }
  0x65   : > { %694 = vmatpush3.msra.mxu0 %v261_v20  ;;  %729 = vmatpush3.msra.mxu1 %v261_v20 }
  0x66   : > { %695 = vmatprep.subr.mxu0 %v260_v22  ;;  %730 = vmatprep.subr.mxu1 %v940_v0 }
  0x67   : > { %696 = vmatpush3.msra.mxu0 %v260_v22  ;;  %731 = vmatpush3.msra.mxu1 %v260_v22 }
  0x68   : > { %697 = vmatprep.subr.mxu0 %v259_v25  ;;  %732 = vmatprep.subr.mxu1 %v940_v0 }
  0x69   : > { %698 = vmatpush3.msra.mxu0 %v259_v25  ;;  %733 = vmatpush3.msra.mxu1 %v259_v25 }
  0x6a   : > { %700 = vmatmul.mubr.f32.vlgmr.msra.gmra.mxu0 %v1122_v6  ;;  %735 = vmatmul.mubr.f32.vlgmr.msra.gmra.mxu1 %v284_v26 }
 0x12a   : > { %v701_v40 = vpop.f32.mrf.mxu0  ;;  %v426_v41 = vpop.f32.mrf.mxu1 }
 0x12b   : > { %v465_v42 = vadd.f32 %v701_v40, %v461_v38  ;;  %v467_v45 = vmul.f32 %v701_v40, %v701_v40 }
 0x12c   : > { %v351_v43 = vpop.f32.mrf.mxu0  ;;  %v736_v44 = vpop.f32.mrf.mxu1 }
 0x12d   : > { %v464_v46 = vadd.f32 %v457_v39, %v351_v43  ;;  %v466_v47 = vmul.f32 %v351_v43, %v351_v43  ;;  %v510_v48 = vmul.f32 %v465_v42, %v465_v42 }
 0x12f   : > { %v468_v49 = vadd.f32 %v467_v45, %v466_v47  ;;  %v509_v50 = vmul.f32 %v464_v46, %v464_v46 }
 0x131   : > { %805 = vrsqrt.f32 %v468_v49  ;;  %v511_v51 = vadd.f32 %v510_v48, %v509_v50  ;;  %vm471_vm3 = vcmp.eq.f32.partialorder %v468_v49, inf  ;;  %v474_v54 = vand.u32 2147483648, %v468_v49 }
 0x132   : > { %vm473_vm4 = vcmp.eq.f32.partialorder %v468_v49, 0.0 }
 0x133   : > { %v512_v4 = vmax.f32 %v511_v51, 1e-16 }
 0x13e   : > { %v806_v52 = vpop.eup %805 }
 0x13f   : > { %v470_v53 = vmul.f32 %v806_v52, %v468_v49 }
 0x141   : > { %v472_v55 = vsel %vm471_vm3, %v468_v49, %v470_v53 }
 0x142   : > { %v475_v56 = vsel %vm473_vm4, %v474_v54, %v472_v55 }
 0x143   : > { %v476_v57 = vadd.f32 %v475_v56, %v426_v41 }
 0x145   : > { %v477_v58 = vmul.f32 0.5, %v476_v57 }
 0x147   : > { %478 = vadd.xlane.f32.xlu0 %v477_v58  ;;  %v481_v59 = vmul.f32 %v477_v58, %v477_v58 }
 0x14b   : > { %482 = vadd.xlane.f32.xlu0 %v481_v59 }
 0x1d0   : > { %v479_v60 = vpop.xlane.xlu0 %478 }
 0x1d1   : > { %v480_v61 = vmul.f32 0.03125, %v479_v60 }
 0x1d3   : > { %v485_v63 = vmul.f32 %v480_v61, %v480_v61  ;;  %v488_v5 = vsub.f32 %v477_v58, %v480_v61 }
 0x1d4   : > { %v483_v62 = vpop.xlane.xlu0 %482 }
 0x1d5   : > { %v484_v0 = vmul.f32 0.03125, %v483_v62 }
 0x1d7   : > { %v486_v1 = vsub.f32 %v484_v0, %v485_v63 }
 0x1d9   : > { %v487_v2 = vmax.f32 %v486_v1, 0.0 }
 0x1db   : > { %v489_v3 = vadd.f32 1e-05, %v487_v2 }
 0x1dd   : > { %807 = vrsqrt.f32 %v489_v3 }
 0x1de   : > { %809 = vrsqrt.f32 %v512_v4 }
 0x1ea   : > { %v808_v6 = vpop.eup %807 }
 0x1eb   : > { %v491_v8 = vmul.f32 %v808_v6, %v488_v5  ;;  %v810_v13 = vpop.eup %809 }
 0x1ed   : > { %v499_v10 = vmul.f32 %v626_v7, %v491_v8 }
 0x1ef   : > { %v507_v11 = vadd.f32 %v627_v9, %v499_v10 }
 0x1f1   : > { %v508_v12 = vmax.f32 %v507_v11, 0.0 }
 0x1f3   : > { %v514_v14 = vmul.f32 %v810_v13, %v508_v12 }
 0x1f5   : > { %v515_v15 = vmul.f32 %v514_v14, %v464_v46  ;;  %v516_v16 = vmul.f32 %v514_v14, %v465_v42 }
 0x1f7   : > { %517 = vst [vmem:[%s256_s23] sm:$0xff] %v515_v15  ;;  %518 = vst [vmem:[%s256_s23 + $0x8] sm:$0xff] %v516_v16 }
 0x1f8   : > { %878 = shalt.err (!%p875_p10)
}
 0x1f9   : > { %s879_s7 = scalar_lea.hbm %s1163_s16, 256  ;;  %s883_s15 = scalar_lea.hbm %s1213_s5, 512 }
 0x1fa   : > { %p880_p5 = scmp.ne.s32.totalorder %s1163_s16, %s879_s7  ;;  %p884_p4 = scmp.lt.s32.totalorder %s1163_s16, %s1213_s5 }
 0x1fb   : > { %p885_p0 = scmp.lt.s32.totalorder %s883_s15, %s879_s7 }
 0x1fc   : > { %p881_p11 = pnand %p880_p5, %p1231_p13 }
 0x1fd   : > { %p886_p1 = por %p885_p0, %p884_p4 }
 0x1fe   : > { %p882_p6 = pneg %p881_p11 }
 0x200   : > { %p887_p12 = pnand %p886_p1, %p882_p6 }
 0x202   : > { %890 = shalt.err (!%p887_p12)
}
 0x203   : > { %s944_s23 = smov 128   ;;  %s945_s13 = smov 256  }
 0x204   : > { %s946_s9 = smov 8  }
 0x205   : > { %743 = dma.vmem_to_hbm [thread:$0]  (%p1231_p13), %s1165_s12, 256, %s1163_s16, %s520_s22, %s944_s23, %s945_s13, %s946_s9  }
 0x206 PF: > { %s547_s8 = sand.u32 1, %s921_s18   ;;  %p1232_p2 = scmp.ne.s32.totalorder %s1222_s6, 0 }
 0x207   : > { %p1233_p3 = scmp.ge.s32.totalorder %s933_s21, 2  ;;  %s548_s26 = scalar_lea.sflag [#allocation4], %s547_s8 }
 0x209   : > { %p754_p7 = pnand %p1233_p3, %p1232_p2 }
 0x20b   : > { %p755_p8 = pneg %p754_p7 }
 0x20d   : > { %916 = dma.done.wait (%p755_p8), %s548_s26, 256  }
 0x20e   : > { %918 = vsyncadd (%p755_p8), %s548_s26, 4294967040  ;;  %p19_p9 = scmp.ge.s32.totalorder %s1002_s24, 4   ;;  %s1234_s18 = smov %s925_s19 }
 0x20f   : > { %s1235_s19 = smov %s929_s20  ;;  %s1236_s20 = smov %s1014_s27 }
 0x210   : > { %s1237_s21 = smov %s1002_s24  ;;  %21 = sbr.rel (!%p19_p9) target bundleno = 6 (0x6), region = 89 }
 0x215   :  { %553 = vsyncpa [#allocation3], 1 }
 0x216   :  { %555 = vsyncpa [#allocation3 + $0x1], 1 }
 0x217   :  { %556 = vsyncpa [#allocation6], 1 }
 0x218   :  { %557 = vsyncpa [#allocation4], 1 }
 0x219   :  { %559 = vsyncpa [#allocation4 + $0x1], 1 }

</bundles_post_ra>
